<compile_context>
chip_gen: v7x
topology: tpu7x:2x2x1
jax: 0.10.0
libtpu: 0.0.40
codegen_flags: <defaults>
</compile_context>

<pallas_src>
import functools

import jax
import jax.numpy as jnp
from jax.experimental import pallas as pl
from jax.experimental.pallas import tpu as pltpu

_NEG_LARGE = -1e30  # finite "-inf": keeps exp/-inf arithmetic NaN-free for empty graphs


def _set2set_kernel(x_ref, batch_ref, w_ref, b_ref, out_ref,
                    h_sc, c_sc, qs_sc, m_sc, l_sc, acc_sc,
                    *, in_channels, mxu_dtype):
    C = in_channels
    t = pl.program_id(0)                 # processing step (state carried)
    n = pl.program_id(1)                 # node tile (reduction axis)
    n_last = pl.num_programs(1) - 1

    # ---- start of a processing step: LSTM cell + reset online-softmax state ----
    @pl.when(n == 0)
    def _start_step():
        @pl.when(t == 0)
        def _init_state():
            h_sc[...] = jnp.zeros_like(h_sc)
            c_sc[...] = jnp.zeros_like(c_sc)
            qs_sc[...] = jnp.zeros_like(qs_sc)

        # gates = [q_star || h] @ [W_ih ; W_hh] + (b_ih + b_hh)   (one fused MXU matmul)
        inp = jnp.concatenate([qs_sc[...], h_sc[...]], axis=-1).astype(mxu_dtype)  # (Bp, 3C)
        gates = jnp.dot(inp, w_ref[...], preferred_element_type=jnp.float32) + b_ref[...]
        i_g = jax.nn.sigmoid(gates[:, 0 * C:1 * C])
        f_g = jax.nn.sigmoid(gates[:, 1 * C:2 * C])
        g_g = jnp.tanh(gates[:, 2 * C:3 * C])
        o_g = jax.nn.sigmoid(gates[:, 3 * C:4 * C])
        c_new = f_g * c_sc[...] + i_g * g_g
        c_sc[...] = c_new
        h_sc[...] = o_g * jnp.tanh(c_new)                 # h == q for this step

        m_sc[...] = jnp.full(m_sc.shape, _NEG_LARGE, m_sc.dtype)
        l_sc[...] = jnp.zeros_like(l_sc)
        acc_sc[...] = jnp.zeros_like(acc_sc)

    # ---- per node tile: lane-dense scores + online segment softmax + readout ----
    x_tile = x_ref[...]                                   # (tile_N, C), already mxu dtype
    q = h_sc[...].astype(mxu_dtype)                       # (Bp, C)

    # s[b, i] = <q_b, x_i>  ->  (Bp, tile_N), node index on lanes (lane-dense MXU output)
    s = jax.lax.dot_general(q, x_tile, (((1,), (1,)), ((), ())),
                            preferred_element_type=jnp.float32)

    # membership mask: node i belongs to graph b (padded nodes carry batch = -1)
    graph_ids = jax.lax.broadcasted_iota(jnp.int32, s.shape, 0)     # (Bp, tile_N)
    member = graph_ids == batch_ref[...]                            # batch: (1, tile_N)
    s = jnp.where(member, s, _NEG_LARGE)

    m_prev = m_sc[...]                                              # (Bp, 1)
    m_new = jnp.maximum(m_prev, jnp.max(s, axis=1, keepdims=True))  # (Bp, 1)
    alpha = jnp.exp(m_prev - m_new)                                 # (Bp, 1)
    p = jnp.exp(s - m_new)                                          # (Bp, tile_N)

    m_sc[...] = m_new
    l_sc[...] = alpha * l_sc[...] + jnp.sum(p, axis=1, keepdims=True)
    acc_sc[...] = alpha * acc_sc[...] + jnp.dot(
        p.astype(mxu_dtype), x_tile, preferred_element_type=jnp.float32)   # (Bp, C)

    # ---- end of a processing step: normalize readout, update q_star, emit output ----
    @pl.when(n == n_last)
    def _finish_step():
        r = acc_sc[...] / (l_sc[...] + 1e-16)             # (Bp, C)
        q_star = jnp.concatenate([h_sc[...], r], axis=-1)  # (Bp, 2C)
        qs_sc[...] = q_star
        out_ref[...] = q_star


def set2set_forward(x, batch, params, *, in_channels, processing_steps, batch_size,
                    tile_n=128, mxu_dtype=jnp.bfloat16):
    C = in_channels
    B = batch_size
    N = x.shape[0]
    B_pad = max(8, ((B + 7) // 8) * 8)                    # sublane-aligned graph axis
    N_pad = ((N + tile_n - 1) // tile_n) * tile_n
    n_tiles = N_pad // tile_n

    # pad nodes (batch = -1 matches no graph) and cast MXU operands once in the wrapper
    x_p = jnp.zeros((N_pad, C), mxu_dtype).at[:N].set(x.astype(mxu_dtype))
    batch_p = jnp.full((1, N_pad), -1, jnp.int32).at[0, :N].set(batch.astype(jnp.int32))
    w = jnp.concatenate([params["w_ih_t"], params["w_hh_t"]], axis=0).astype(mxu_dtype)  # (3C,4C)
    b = (params["b_ih"] + params["b_hh"]).astype(jnp.float32)                            # (1,4C)

    kernel = functools.partial(_set2set_kernel, in_channels=C, mxu_dtype=mxu_dtype)

    out = pl.pallas_call(
        kernel,
        out_shape=jax.ShapeDtypeStruct((B_pad, 2 * C), jnp.float32),
        grid_spec=pltpu.PrefetchScalarGridSpec(
            num_scalar_prefetch=0,
            grid=(processing_steps, n_tiles),
            in_specs=[
                pl.BlockSpec((tile_n, C), lambda t, n: (n, 0)),    # x : streamed node tiles
                pl.BlockSpec((1, tile_n), lambda t, n: (0, n)),    # batch ids (row layout)
                pl.BlockSpec((3 * C, 4 * C), lambda t, n: (0, 0)),  # packed LSTM weights
                pl.BlockSpec((1, 4 * C), lambda t, n: (0, 0)),      # packed bias
            ],
            out_specs=pl.BlockSpec((B_pad, 2 * C), lambda t, n: (0, 0)),
            scratch_shapes=[
                pltpu.VMEM((B_pad, C), jnp.float32),       # h (== q)
                pltpu.VMEM((B_pad, C), jnp.float32),       # c
                pltpu.VMEM((B_pad, 2 * C), jnp.float32),   # q_star
                pltpu.VMEM((B_pad, 1), jnp.float32),       # running segment max
                pltpu.VMEM((B_pad, 1), jnp.float32),       # running segment sum
                pltpu.VMEM((B_pad, C), jnp.float32),       # weighted readout accumulator
            ],
        ),
        compiler_params=pltpu.CompilerParams(
            dimension_semantics=("arbitrary", "arbitrary")),
    )(x_p, batch_p, w, b)
    return out[:B]


def set2set_reference(x, batch, params, *, in_channels, processing_steps, batch_size):
    """Pure-JAX f32 reference matching the PyTorch forward."""
    C, B = in_channels, batch_size
    wih, whh = params["w_ih_t"], params["w_hh_t"]
    bias = params["b_ih"] + params["b_hh"]
    h = jnp.zeros((B, C)); c = jnp.zeros((B, C)); q_star = jnp.zeros((B, 2 * C))
    for _ in range(processing_steps):
        gates = q_star @ wih + h @ whh + bias
        i_g = jax.nn.sigmoid(gates[:, :C]); f_g = jax.nn.sigmoid(gates[:, C:2 * C])
        g_g = jnp.tanh(gates[:, 2 * C:3 * C]); o_g = jax.nn.sigmoid(gates[:, 3 * C:])
        c = f_g * c + i_g * g_g
        h = o_g * jnp.tanh(c)
        q = h
        e = jnp.sum(x * q[batch], axis=-1, keepdims=True)
        seg_max = jax.ops.segment_max(e, batch, num_segments=B)
        ex = jnp.exp(e - seg_max[batch])
        seg_sum = jax.ops.segment_sum(ex, batch, num_segments=B)
        a = ex / (seg_sum[batch] + 1e-16)
        r = jax.ops.segment_sum(a * x, batch, num_segments=B)
        q_star = jnp.concatenate([q, r], axis=-1)
    return q_star


if __name__ == "__main__":
    # Small shapes: C=64 channels (2C=128 lane-dense output), N=300 nodes (3 tiles of 128
    # after padding), B=4 graphs, T=3 processing steps.
    C = 64
    N = 300
    B = 4
    T = 3

    key = jax.random.PRNGKey(0)
    kx, k1, k2, k3, k4 = jax.random.split(key, 5)

    x = jax.random.normal(kx, (N, C), dtype=jnp.float32)
    batch = jnp.sort(jnp.arange(N, dtype=jnp.int32) % B)   # every graph has nodes

    # LSTM(input=2C, hidden=C, num_layers=1) parameters, PyTorch-style uniform init.
    # TODO(synk): PyTorch infers batch_size = batch.max().item()+1 at runtime; here it is
    # a static argument (host-side scalar read has no in-kernel equivalent).
    bound = 1.0 / jnp.sqrt(jnp.float32(C))
    params = {
        "w_ih_t": jax.random.uniform(k1, (2 * C, 4 * C), jnp.float32, -bound, bound),
        "w_hh_t": jax.random.uniform(k2, (C, 4 * C), jnp.float32, -bound, bound),
        "b_ih": jax.random.uniform(k3, (1, 4 * C), jnp.float32, -bound, bound),
        "b_hh": jax.random.uniform(k4, (1, 4 * C), jnp.float32, -bound, bound),
    }

    ref = set2set_reference(x, batch, params, in_channels=C,
                            processing_steps=T, batch_size=B)

    # 1) algorithmic check: f32 MXU operands, tight tolerance
    out_f32 = set2set_forward(x, batch, params, in_channels=C, processing_steps=T,
                              batch_size=B, mxu_dtype=jnp.float32)
    out_f32 = jax.block_until_ready(out_f32)
    assert out_f32.shape == (B, 2 * C)
    assert jnp.allclose(out_f32, ref, atol=2e-4, rtol=2e-4), "f32 kernel mismatch"

    # 2) production path: bf16 MXU operands / f32 accumulation, loose tolerance
    out_bf16 = set2set_forward(x, batch, params, in_channels=C, processing_steps=T,
                               batch_size=B, mxu_dtype=jnp.bfloat16)
    out_bf16 = jax.block_until_ready(out_bf16)
    assert out_bf16.shape == (B, 2 * C)
    assert jnp.allclose(out_bf16, ref, atol=5e-2, rtol=5e-2), "bf16 kernel mismatch"

    print("KERNEL_OK")
</pallas_src>

<mosaic_0001>
module attributes {stable_mosaic.version = 11 : i64} {
  func.func @_set2set_kernel(%arg0: i32, %arg1: i32, %arg2: memref<128x64xf32, #tpu.memory_space<vmem>>, %arg3: memref<1x128xi32, #tpu.memory_space<vmem>>, %arg4: memref<192x256xf32, #tpu.memory_space<vmem>>, %arg5: memref<1x256xf32, #tpu.memory_space<vmem>>, %arg6: memref<8x128xf32, #tpu.memory_space<vmem>>, %arg7: memref<8x64xf32, #tpu.memory_space<vmem>>, %arg8: memref<8x64xf32, #tpu.memory_space<vmem>>, %arg9: memref<8x128xf32, #tpu.memory_space<vmem>>, %arg10: memref<8x1xf32, #tpu.memory_space<vmem>>, %arg11: memref<8x1xf32, #tpu.memory_space<vmem>>, %arg12: memref<8x64xf32, #tpu.memory_space<vmem>>) attributes {dimension_semantics = [#tpu.dimension_semantics<arbitrary>, #tpu.dimension_semantics<arbitrary>], iteration_bounds = array<i64: 3, 3>, scalar_prefetch = 0 : i64, scratch_operands = 6 : i64, tpu.core_type = #tpu.core_type<tc>, window_params = [{transform_indices = @transform_0, window_bounds = array<i64: 128, 64>}, {transform_indices = @transform_1, window_bounds = array<i64: 1, 128>}, {pipeline_mode = #tpu.pipeline_mode<synchronous>, transform_indices = @transform_2, window_bounds = array<i64: 192, 256>}, {pipeline_mode = #tpu.pipeline_mode<synchronous>, transform_indices = @transform_3, window_bounds = array<i64: 1, 256>}, {pipeline_mode = #tpu.pipeline_mode<synchronous>, transform_indices = @transform_4, window_bounds = array<i64: 8, 128>}]} {
    %c0_i32 = arith.constant 0 : i32
    %0 = arith.cmpi eq, %arg1, %c0_i32 : i32
    %1 = arith.extui %0 : i1 to i32
    %c0_i32_0 = arith.constant 0 : i32
    %2 = arith.cmpi ne, %1, %c0_i32_0 : i32
    scf.if %2 {
      %c0_i32_23 = arith.constant 0 : i32
      %37 = arith.cmpi eq, %arg0, %c0_i32_23 : i32
      %38 = arith.extui %37 : i1 to i32
      %c0_i32_24 = arith.constant 0 : i32
      %39 = arith.cmpi ne, %38, %c0_i32_24 : i32
      scf.if %39 {
        %cst_52 = arith.constant 0.000000e+00 : f32
        %82 = vector.broadcast %cst_52 : f32 to vector<8x64xf32>
        %c0_53 = arith.constant 0 : index
        %c0_54 = arith.constant 0 : index
        %83 = vector.load %arg7[%c0_53, %c0_54] : memref<8x64xf32, #tpu.memory_space<vmem>>, vector<8x64xf32>
        tpu.vector_store %arg7[%c0_53, %c0_54], %82 {strides = array<i32>} : memref<8x64xf32, #tpu.memory_space<vmem>>, vector<8x64xf32>,
        %cst_55 = arith.constant 0.000000e+00 : f32
        %84 = vector.broadcast %cst_55 : f32 to vector<8x64xf32>
        %c0_56 = arith.constant 0 : index
        %c0_57 = arith.constant 0 : index
        %85 = vector.load %arg8[%c0_56, %c0_57] : memref<8x64xf32, #tpu.memory_space<vmem>>, vector<8x64xf32>
        tpu.vector_store %arg8[%c0_56, %c0_57], %84 {strides = array<i32>} : memref<8x64xf32, #tpu.memory_space<vmem>>, vector<8x64xf32>,
        %cst_58 = arith.constant 0.000000e+00 : f32
        %86 = vector.broadcast %cst_58 : f32 to vector<8x128xf32>
        %c0_59 = arith.constant 0 : index
        %c0_60 = arith.constant 0 : index
        %87 = vector.load %arg9[%c0_59, %c0_60] : memref<8x128xf32, #tpu.memory_space<vmem>>, vector<8x128xf32>
        tpu.vector_store %arg9[%c0_59, %c0_60], %86 {strides = array<i32>} : memref<8x128xf32, #tpu.memory_space<vmem>>, vector<8x128xf32>,
      } else {
      }
      %c0_25 = arith.constant 0 : index
      %c0_26 = arith.constant 0 : index
      %40 = vector.load %arg9[%c0_25, %c0_26] : memref<8x128xf32, #tpu.memory_space<vmem>>, vector<8x128xf32>
      %c0_27 = arith.constant 0 : index
      %c0_28 = arith.constant 0 : index
      %41 = vector.load %arg7[%c0_27, %c0_28] : memref<8x64xf32, #tpu.memory_space<vmem>>, vector<8x64xf32>
      %42 = tpu.concatenate %40, %41 in 1 : vector<8x128xf32>, vector<8x64xf32> -> vector<8x192xf32>
      %c0_29 = arith.constant 0 : index
      %c0_30 = arith.constant 0 : index
      %43 = vector.load %arg4[%c0_29, %c0_30] : memref<192x256xf32, #tpu.memory_space<vmem>>, vector<192x256xf32>
      %cst_31 = arith.constant dense<0.000000e+00> : vector<8x256xf32>
      %44 = tpu.matmul %42, %43, %cst_31 {dimension_numbers = #tpu.dot_dimension_numbers<[1], [0], [0], [1], [0, 0, 1, 1], [], []>} : vector<8x192xf32>, vector<192x256xf32>, vector<8x256xf32> -> vector<8x256xf32>
      %c0_32 = arith.constant 0 : index
      %c0_33 = arith.constant 0 : index
      %45 = vector.load %arg5[%c0_32, %c0_33] : memref<1x256xf32, #tpu.memory_space<vmem>>, vector<1x256xf32>
      %46 = vector.broadcast %45 : vector<1x256xf32> to vector<8x256xf32>
      %47 = arith.addf %44, %46 : vector<8x256xf32>
      %48 = vector.extract_strided_slice %47 {offsets = [0, 0], sizes = [8, 64], strides = [1, 1]} : vector<8x256xf32> to vector<8x64xf32>
      %49 = arith.negf %48 : vector<8x64xf32>
      %50 = math.exp %49 : vector<8x64xf32>
      %cst_34 = arith.constant 1.000000e+00 : f32
      %51 = vector.broadcast %cst_34 : f32 to vector<8x64xf32>
      %52 = arith.addf %51, %50 : vector<8x64xf32>
      %53 = arith.divf %51, %52 : vector<8x64xf32>
      %54 = vector.extract_strided_slice %47 {offsets = [0, 64], sizes = [8, 64], strides = [1, 1]} : vector<8x256xf32> to vector<8x64xf32>
      %55 = arith.negf %54 : vector<8x64xf32>
      %56 = math.exp %55 : vector<8x64xf32>
      %cst_35 = arith.constant 1.000000e+00 : f32
      %57 = vector.broadcast %cst_35 : f32 to vector<8x64xf32>
      %58 = arith.addf %57, %56 : vector<8x64xf32>
      %59 = arith.divf %57, %58 : vector<8x64xf32>
      %60 = vector.extract_strided_slice %47 {offsets = [0, 128], sizes = [8, 64], strides = [1, 1]} : vector<8x256xf32> to vector<8x64xf32>
      %61 = math.tanh %60 : vector<8x64xf32>
      %62 = vector.extract_strided_slice %47 {offsets = [0, 192], sizes = [8, 64], strides = [1, 1]} : vector<8x256xf32> to vector<8x64xf32>
      %63 = arith.negf %62 : vector<8x64xf32>
      %64 = math.exp %63 : vector<8x64xf32>
      %cst_36 = arith.constant 1.000000e+00 : f32
      %65 = vector.broadcast %cst_36 : f32 to vector<8x64xf32>
      %66 = arith.addf %65, %64 : vector<8x64xf32>
      %67 = arith.divf %65, %66 : vector<8x64xf32>
      %c0_37 = arith.constant 0 : index
      %c0_38 = arith.constant 0 : index
      %68 = vector.load %arg8[%c0_37, %c0_38] : memref<8x64xf32, #tpu.memory_space<vmem>>, vector<8x64xf32>
      %69 = arith.mulf %59, %68 : vector<8x64xf32>
      %70 = arith.mulf %53, %61 : vector<8x64xf32>
      %71 = arith.addf %69, %70 : vector<8x64xf32>
      %c0_39 = arith.constant 0 : index
      %c0_40 = arith.constant 0 : index
      %72 = vector.load %arg8[%c0_39, %c0_40] : memref<8x64xf32, #tpu.memory_space<vmem>>, vector<8x64xf32>
      tpu.vector_store %arg8[%c0_39, %c0_40], %71 {strides = array<i32>} : memref<8x64xf32, #tpu.memory_space<vmem>>, vector<8x64xf32>,
      %73 = math.tanh %71 : vector<8x64xf32>
      %74 = arith.mulf %67, %73 : vector<8x64xf32>
      %c0_41 = arith.constant 0 : index
      %c0_42 = arith.constant 0 : index
      %75 = vector.load %arg7[%c0_41, %c0_42] : memref<8x64xf32, #tpu.memory_space<vmem>>, vector<8x64xf32>
      tpu.vector_store %arg7[%c0_41, %c0_42], %74 {strides = array<i32>} : memref<8x64xf32, #tpu.memory_space<vmem>>, vector<8x64xf32>,
      %cst_43 = arith.constant -1.000000e+30 : f32
      %76 = vector.broadcast %cst_43 : f32 to vector<8x1xf32>
      %c0_44 = arith.constant 0 : index
      %c0_45 = arith.constant 0 : index
      %77 = vector.load %arg10[%c0_44, %c0_45] : memref<8x1xf32, #tpu.memory_space<vmem>>, vector<8x1xf32>
      tpu.vector_store %arg10[%c0_44, %c0_45], %76 {strides = array<i32>} : memref<8x1xf32, #tpu.memory_space<vmem>>, vector<8x1xf32>,
      %cst_46 = arith.constant 0.000000e+00 : f32
      %78 = vector.broadcast %cst_46 : f32 to vector<8x1xf32>
      %c0_47 = arith.constant 0 : index
      %c0_48 = arith.constant 0 : index
      %79 = vector.load %arg11[%c0_47, %c0_48] : memref<8x1xf32, #tpu.memory_space<vmem>>, vector<8x1xf32>
      tpu.vector_store %arg11[%c0_47, %c0_48], %78 {strides = array<i32>} : memref<8x1xf32, #tpu.memory_space<vmem>>, vector<8x1xf32>,
      %cst_49 = arith.constant 0.000000e+00 : f32
      %80 = vector.broadcast %cst_49 : f32 to vector<8x64xf32>
      %c0_50 = arith.constant 0 : index
      %c0_51 = arith.constant 0 : index
      %81 = vector.load %arg12[%c0_50, %c0_51] : memref<8x64xf32, #tpu.memory_space<vmem>>, vector<8x64xf32>
      tpu.vector_store %arg12[%c0_50, %c0_51], %80 {strides = array<i32>} : memref<8x64xf32, #tpu.memory_space<vmem>>, vector<8x64xf32>,
    } else {
    }
    %c0 = arith.constant 0 : index
    %c0_1 = arith.constant 0 : index
    %3 = vector.load %arg2[%c0, %c0_1] : memref<128x64xf32, #tpu.memory_space<vmem>>, vector<128x64xf32>
    %c0_2 = arith.constant 0 : index
    %c0_3 = arith.constant 0 : index
    %4 = vector.load %arg7[%c0_2, %c0_3] : memref<8x64xf32, #tpu.memory_space<vmem>>, vector<8x64xf32>
    %cst = arith.constant dense<0.000000e+00> : vector<8x128xf32>
    %5 = tpu.matmul %4, %3, %cst {dimension_numbers = #tpu.dot_dimension_numbers<[1], [1], [0], [0], [0, 0, 1, 0], [], []>} : vector<8x64xf32>, vector<128x64xf32>, vector<8x128xf32> -> vector<8x128xf32>
    %6 = tpu.iota {dimensions = array<i32: 0>} : vector<8x128xi32>
    %c0_4 = arith.constant 0 : index
    %c0_5 = arith.constant 0 : index
    %7 = vector.load %arg3[%c0_4, %c0_5] : memref<1x128xi32, #tpu.memory_space<vmem>>, vector<1x128xi32>
    %8 = vector.broadcast %7 : vector<1x128xi32> to vector<8x128xi32>
    %9 = arith.cmpi eq, %6, %8 : vector<8x128xi32>
    %cst_6 = arith.constant -1.000000e+30 : f32
    %10 = vector.broadcast %cst_6 : f32 to vector<8x128xf32>
    %11 = arith.select %9, %5, %10 : vector<8x128xi1>, vector<8x128xf32>
    %c0_7 = arith.constant 0 : index
    %c0_8 = arith.constant 0 : index
    %12 = vector.load %arg10[%c0_7, %c0_8] : memref<8x1xf32, #tpu.memory_space<vmem>>, vector<8x1xf32>
    %cst_9 = arith.constant dense<0xFF800000> : vector<8xf32>
    %13 = vector.multi_reduction <maximumf>, %11, %cst_9 [1] : vector<8x128xf32> to vector<8xf32>
    %14 = vector.shape_cast %13 : vector<8xf32> to vector<8x1xf32>
    %15 = arith.maximumf %12, %14 : vector<8x1xf32>
    %16 = arith.subf %12, %15 : vector<8x1xf32>
    %17 = math.exp %16 : vector<8x1xf32>
    %18 = vector.broadcast %15 : vector<8x1xf32> to vector<8x128xf32>
    %19 = arith.subf %11, %18 : vector<8x128xf32>
    %20 = math.exp %19 : vector<8x128xf32>
    %c0_10 = arith.constant 0 : index
    %c0_11 = arith.constant 0 : index
    %21 = vector.load %arg10[%c0_10, %c0_11] : memref<8x1xf32, #tpu.memory_space<vmem>>, vector<8x1xf32>
    tpu.vector_store %arg10[%c0_10, %c0_11], %15 {strides = array<i32>} : memref<8x1xf32, #tpu.memory_space<vmem>>, vector<8x1xf32>,
    %c0_12 = arith.constant 0 : index
    %c0_13 = arith.constant 0 : index
    %22 = vector.load %arg11[%c0_12, %c0_13] : memref<8x1xf32, #tpu.memory_space<vmem>>, vector<8x1xf32>
    %23 = arith.mulf %17, %22 : vector<8x1xf32>
    %cst_14 = arith.constant dense<0.000000e+00> : vector<8xf32>
    %24 = vector.multi_reduction <add>, %20, %cst_14 [1] : vector<8x128xf32> to vector<8xf32>
    %25 = vector.shape_cast %24 : vector<8xf32> to vector<8x1xf32>
    %26 = arith.addf %23, %25 : vector<8x1xf32>
    %c0_15 = arith.constant 0 : index
    %c0_16 = arith.constant 0 : index
    %27 = vector.load %arg11[%c0_15, %c0_16] : memref<8x1xf32, #tpu.memory_space<vmem>>, vector<8x1xf32>
    tpu.vector_store %arg11[%c0_15, %c0_16], %26 {strides = array<i32>} : memref<8x1xf32, #tpu.memory_space<vmem>>, vector<8x1xf32>,
    %c0_17 = arith.constant 0 : index
    %c0_18 = arith.constant 0 : index
    %28 = vector.load %arg12[%c0_17, %c0_18] : memref<8x64xf32, #tpu.memory_space<vmem>>, vector<8x64xf32>
    %29 = vector.broadcast %17 : vector<8x1xf32> to vector<8x64xf32>
    %30 = arith.mulf %29, %28 : vector<8x64xf32>
    %cst_19 = arith.constant dense<0.000000e+00> : vector<8x64xf32>
    %31 = tpu.matmul %20, %3, %cst_19 {dimension_numbers = #tpu.dot_dimension_numbers<[1], [0], [0], [1], [0, 0, 1, 1], [], []>} : vector<8x128xf32>, vector<128x64xf32>, vector<8x64xf32> -> vector<8x64xf32>
    %32 = arith.addf %30, %31 : vector<8x64xf32>
    %c0_20 = arith.constant 0 : index
    %c0_21 = arith.constant 0 : index
    %33 = vector.load %arg12[%c0_20, %c0_21] : memref<8x64xf32, #tpu.memory_space<vmem>>, vector<8x64xf32>
    tpu.vector_store %arg12[%c0_20, %c0_21], %32 {strides = array<i32>} : memref<8x64xf32, #tpu.memory_space<vmem>>, vector<8x64xf32>,
    %c2_i32 = arith.constant 2 : i32
    %34 = arith.cmpi eq, %arg1, %c2_i32 : i32
    %35 = arith.extui %34 : i1 to i32
    %c0_i32_22 = arith.constant 0 : i32
    %36 = arith.cmpi ne, %35, %c0_i32_22 : i32
    scf.if %36 {
      %c0_23 = arith.constant 0 : index
      %c0_24 = arith.constant 0 : index
      %37 = vector.load %arg12[%c0_23, %c0_24] : memref<8x64xf32, #tpu.memory_space<vmem>>, vector<8x64xf32>
      %c0_25 = arith.constant 0 : index
      %c0_26 = arith.constant 0 : index
      %38 = vector.load %arg11[%c0_25, %c0_26] : memref<8x1xf32, #tpu.memory_space<vmem>>, vector<8x1xf32>
      %cst_27 = arith.constant 1.000000e-16 : f32
      %39 = vector.broadcast %cst_27 : f32 to vector<8x1xf32>
      %40 = arith.addf %38, %39 : vector<8x1xf32>
      %41 = vector.broadcast %40 : vector<8x1xf32> to vector<8x64xf32>
      %42 = arith.divf %37, %41 : vector<8x64xf32>
      %c0_28 = arith.constant 0 : index
      %c0_29 = arith.constant 0 : index
      %43 = vector.load %arg7[%c0_28, %c0_29] : memref<8x64xf32, #tpu.memory_space<vmem>>, vector<8x64xf32>
      %44 = tpu.concatenate %43, %42 in 1 : vector<8x64xf32>, vector<8x64xf32> -> vector<8x128xf32>
      %c0_30 = arith.constant 0 : index
      %c0_31 = arith.constant 0 : index
      %45 = vector.load %arg9[%c0_30, %c0_31] : memref<8x128xf32, #tpu.memory_space<vmem>>, vector<8x128xf32>
      tpu.vector_store %arg9[%c0_30, %c0_31], %44 {strides = array<i32>} : memref<8x128xf32, #tpu.memory_space<vmem>>, vector<8x128xf32>,
      %c0_32 = arith.constant 0 : index
      %c0_33 = arith.constant 0 : index
      %46 = vector.load %arg6[%c0_32, %c0_33] : memref<8x128xf32, #tpu.memory_space<vmem>>, vector<8x128xf32>
      tpu.vector_store %arg6[%c0_32, %c0_33], %44 {strides = array<i32>} : memref<8x128xf32, #tpu.memory_space<vmem>>, vector<8x128xf32>,
    } else {
    }
    return
  }
  func.func @transform_0(%arg0: i32, %arg1: i32) -> (i32, i32) {
    %c0_i32 = arith.constant 0 : i32
    %c0_i32_0 = arith.constant 0 : i32
    return %arg1, %c0_i32 : i32, i32
  }
  func.func @transform_1(%arg0: i32, %arg1: i32) -> (i32, i32) {
    %c0_i32 = arith.constant 0 : i32
    %c0_i32_0 = arith.constant 0 : i32
    return %c0_i32, %arg1 : i32, i32
  }
  func.func @transform_2(%arg0: i32, %arg1: i32) -> (i32, i32) {
    %c0_i32 = arith.constant 0 : i32
    %c0_i32_0 = arith.constant 0 : i32
    %c0_i32_1 = arith.constant 0 : i32
    return %c0_i32, %c0_i32_0 : i32, i32
  }
  func.func @transform_3(%arg0: i32, %arg1: i32) -> (i32, i32) {
    %c0_i32 = arith.constant 0 : i32
    %c0_i32_0 = arith.constant 0 : i32
    %c0_i32_1 = arith.constant 0 : i32
    return %c0_i32, %c0_i32_0 : i32, i32
  }
  func.func @transform_4(%arg0: i32, %arg1: i32) -> (i32, i32) {
    %c0_i32 = arith.constant 0 : i32
    %c0_i32_0 = arith.constant 0 : i32
    %c0_i32_1 = arith.constant 0 : i32
    return %c0_i32, %c0_i32_0 : i32, i32
  }
}

</mosaic_0001>

<bundles_post_ra>
// kernel: tpu_custom_call.1
= control target key start
LH: loop header
LB: loop body
LE: loop exit
PB: predicated region body
PF: predicated region fallthrough
CT: control target
= control target key end

     0   :  { %9 = vsyncpa [#allocation9], 0  ;;  %s1167_s15 = smov 0   ;;  %s1169_s16 = smov 0   ;;  %s1462_s0 = inlined_call_operand.vmem [shape: f32[384,64], index: 0, kind: input, shape index: {}]   ;;  %s1463_s1 = inlined_call_operand.vmem [shape: s32[1,384], index: 1, kind: input, shape index: {}]   ;;  %s1464_s2 = inlined_call_operand.vmem [shape: f32[192,256], index: 2, kind: input, shape index: {}]   ;;  %s1465_s3 = inlined_call_operand.vmem [shape: f32[1,256], index: 3, kind: input, shape index: {}]   ;;  %s1466_s4 = inlined_call_operand.hbm [shape: f32[8,128], index: 4, kind: output, shape index: {}]  }
   0x1   :  { %s1171_s17 = smov 0   ;;  %s1173_s18 = smov 0  }
   0x2   :  { %s1175_s19 = smov 0  }
   0x3 LB: > { %s741_s20 = sadd.s32 4294967295, %s1129_s19   ;;  %s24_s21 = sadd.s32 1, %s1121_s17  ;;  %s1129_s19 = sphi %s1175_s19, %s15_s19   ;;  %s1125_s18 = sphi %s1173_s18, %s1473_s18   ;;  %s1121_s17 = sphi %s1171_s17, %s1472_s17   ;;  %s1117_s16 = sphi %s1169_s16, %s1471_s16   ;;  %s1113_s15 = sphi %s1167_s15, %s1470_s15  }
   0x4   : > { %p25_p0 = scmp.ge.s32.totalorder %s24_s21, 3  ;;  %s27_s22 = sadd.s32 1, %s1125_s18 }
   0x5   : > { %p744_p1 = scmp.ge.s32.totalorder %s1129_s19, 1  ;;  %p179_p2 = scmp.lt.s32.totalorder %s1129_s19, 10 }
   0x6   : > { %s1475_s21 = smov (%p25_p0, %s24_s21), 0  ;;  %s1477_s22 = smov (!%p25_p0, %s27_s22), %s1125_s18 }
   0x7   : > { %p180_p3 = pnand %p744_p1, %p179_p2  ;;  %p29_p4 = scmp.ge.s32.totalorder %s1477_s22, 3 }
   0x8   : > { %s745_s23 = sshll.u32 (!%p180_p3), %s1113_s15, 4  ;;  %p209_p5 = scmp.lt.s32.totalorder (!%p180_p3), %s1113_s15, 2 }
   0x9   : > { %s1479_s22 = smov (%p29_p4, %s1477_s22), 0  ;;  %183 = sbr.rel (%p180_p3) target bundleno = 1573 (0x625), region = 36 }
   0xa   : > { %p204_p6 = scmp.lt.s32.totalorder (!%p180_p3), %s745_s23, 47  ;;  %p747_p7 = scmp.ne.s32.totalorder (!%p180_p3), %s1113_s15, 0 }
  0x10   : > { %s1203_s24 = scalar_select %p209_p5, %s1113_s15, 2 }
  0x11   : > { %s1481_s23 = smov (!%p204_p6, %s745_s23), 47  ;;  %215 = sbr.rel (%p747_p7) target bundleno = 570 (0x23a), region = 40 }
  0x12   : > { %s211_s27 = scalar_lea.vmem %s1463_s1, %s1203_s24  ;;  %s746_s28 = sshll.u32 %s1481_s23, 3 }
  0x13   : > { %s1212_s5 = scalar_lea.vmem %s1462_s0, %s746_s28  ;;  %p748_p8 = scmp.ne.s32.totalorder (!%p747_p7), %s1117_s16, 0 }
  0x18   : > { %219 = sbr.rel (%p748_p8) target bundleno = 31 (0x1f), region = 44  ;;  %vm220_vm0 = vcmask (!%p748_p8), 523264   ;;  %v1131_v0 = vmov (!%p748_p8), 0.0  }
  0x19   : > { %221 = vst.msk [vmem:[#allocation2] sm:$0xff] (!%p748_p8), %vm220_vm0, %v1131_v0  ;;  %222 = vst.msk [vmem:[#allocation3] sm:$0xff] (!%p748_p8), %vm220_vm0, %v1131_v0 }
  0x1a   : > { %223 = vst [vmem:[#allocation4] sm:$0xff] (!%p748_p8), %v1131_v0 }
  0x1f PF: > { %v227_v1 = vld [vmem:[%s1464_s2 + $0x8] sm:$0xff]  ;;  %v229_v2 = vld [vmem:[%s1464_s2 + $0x18] sm:$0xff]  ;;  %v226_v3 = vld [vmem:[%s1464_s2] sm:$0xff]  ;;  %vm286_vm1 = vcmask 523264   ;;  %vm398_vm2 = vcmask 7168   ;;  %v1132_v8 = vmov 0.0  }
  0x20   : > { %v879_v4 = vpack.c.bf16 %v229_v2, %v227_v1  ;;  %v228_v5 = vld [vmem:[%s1464_s2 + $0x10] sm:$0xff]  ;;  %v231_v6 = vld [vmem:[%s1464_s2 + $0x28] sm:$0xff]  ;;  %v233_v7 = vld [vmem:[%s1464_s2 + $0x38] sm:$0xff]  ;;  %400 = vst.msk [vmem:[#allocation6] sm:$0xff] %vm398_vm2, %v1132_v8  ;;  %v1133_v14 = vmov -1e+30  }
  0x21   : > { %401 = vst.msk [vmem:[#allocation7] sm:$0xff] %vm286_vm1, %v1132_v8  ;;  %v881_v9 = vpack.c.bf16 %v228_v5, %v226_v3  ;;  %v883_v10 = vpack.c.bf16 %v233_v7, %v231_v6  ;;  %v230_v11 = vld [vmem:[%s1464_s2 + $0x20] sm:$0xff]  ;;  %v232_v12 = vld [vmem:[%s1464_s2 + $0x30] sm:$0xff]  ;;  %v235_v13 = vld [vmem:[%s1464_s2 + $0x48] sm:$0xff]  ;;  %s1134_s10 = smov 64  }
  0x22   : > { %399 = vst.msk [vmem:[#allocation5] sm:$0xff] %vm398_vm2, %v1133_v14  ;;  %880 = vmatprep.subr.bf16.mxu0 %v879_v4  ;;  %v237_v15 = vld [vmem:[%s1464_s2 + $0x58] sm:$0xff]  ;;  %v885_v16 = vpack.c.bf16 %v232_v12, %v230_v11  ;;  %v234_v18 = vld [vmem:[%s1464_s2 + $0x40] sm:$0xff]  ;;  %v236_v19 = vld [vmem:[%s1464_s2 + $0x50] sm:$0xff]  ;;  %v276_v14 = vlaneseq }
  0x23   : > { %882 = vmatpush1.bf16.msra.mxu0 %v881_v9  ;;  %v887_v17 = vpack.c.bf16 %v237_v15, %v235_v13  ;;  %v239_v20 = vld [vmem:[%s1464_s2 + $0x68] sm:$0xff]  ;;  %v241_v21 = vld [vmem:[%s1464_s2 + $0x78] sm:$0xff]  ;;  %v889_v22 = vpack.c.bf16 %v236_v19, %v234_v18  ;;  %v238_v24 = vld [vmem:[%s1464_s2 + $0x60] sm:$0xff] }
  0x24   : > { %884 = vmatprep.subr.bf16.mxu0 %v883_v10  ;;  %v891_v23 = vpack.c.bf16 %v241_v21, %v239_v20  ;;  %v240_v25 = vld [vmem:[%s1464_s2 + $0x70] sm:$0xff]  ;;  %v243_v26 = vld [vmem:[%s1464_s2 + $0x88] sm:$0xff]  ;;  %v245_v27 = vld [vmem:[%s1464_s2 + $0x98] sm:$0xff]  ;;  %v277_v15 = vshrl.u32 %v276_v14, 7 }
  0x25   : > { %v893_v28 = vpack.c.bf16 %v240_v25, %v238_v24  ;;  %v895_v29 = vpack.c.bf16 %v245_v27, %v243_v26  ;;  %v242_v30 = vld [vmem:[%s1464_s2 + $0x80] sm:$0xff]  ;;  %v244_v31 = vld [vmem:[%s1464_s2 + $0x90] sm:$0xff]  ;;  %v247_v32 = vld [vmem:[%s1464_s2 + $0xa8] sm:$0xff] }
  0x26   : > { %v249_v33 = vld [vmem:[%s1464_s2 + $0xb8] sm:$0xff]  ;;  %v897_v34 = vpack.c.bf16 %v244_v31, %v242_v30  ;;  %v225_v35 = vld [vmem:[#allocation2] sm:$0xff]  ;;  %v374_v36 = vld [vmem:[#allocation3] sm:$0xff] }
  0x27   : > { %886 = vmatpush1.bf16.msra.mxu0 %v885_v16  ;;  %v899_v37 = vpack.c.bf16 %v249_v33, %v247_v32  ;;  %v246_v38 = vld [vmem:[%s1464_s2 + $0xa0] sm:$0xff]  ;;  %v248_v39 = vld [vmem:[%s1464_s2 + $0xb0] sm:$0xff]  ;;  %749 = vmatprep.mubr.msk.f32.mxu0 %vm286_vm1, %v225_v35  ;;  %v251_v40 = vld [vmem:[%s1464_s2 + $0xc8] sm:$0xff]  ;;  %v278_v16 = vsub.s32 0, %v277_v15 }
  0x28   : > { %888 = vmatprep.subr.bf16.mxu0 %v887_v17  ;;  %v253_v41 = vld [vmem:[%s1464_s2 + $0xd8] sm:$0xff]  ;;  %376 = vrot.lane.b32.xlu0 %v374_v36, %s1134_s10  ;;  %v901_v42 = vpack.c.bf16 %v248_v39, %v246_v38  ;;  %v250_v44 = vld [vmem:[%s1464_s2 + $0xc0] sm:$0xff]  ;;  %v252_v45 = vld [vmem:[%s1464_s2 + $0xd0] sm:$0xff] }
  0x29   : > { %v903_v43 = vpack.c.bf16 %v253_v41, %v251_v40  ;;  %v255_v46 = vld [vmem:[%s1464_s2 + $0xe8] sm:$0xff]  ;;  %v257_v47 = vld [vmem:[%s1464_s2 + $0xf8] sm:$0xff]  ;;  %v905_v48 = vpack.c.bf16 %v252_v45, %v250_v44  ;;  %v254_v50 = vld [vmem:[%s1464_s2 + $0xe0] sm:$0xff] }
  0x2a   : > { %v907_v49 = vpack.c.bf16 %v257_v47, %v255_v46  ;;  %v256_v51 = vld [vmem:[%s1464_s2 + $0xf0] sm:$0xff]  ;;  %v259_v52 = vld [vmem:[%s1464_s2 + $0x108] sm:$0xff]  ;;  %v261_v53 = vld [vmem:[%s1464_s2 + $0x118] sm:$0xff] }
  0x2b   : > { %890 = vmatpush1.bf16.msra.mxu0 %v889_v22  ;;  %v909_v54 = vpack.c.bf16 %v256_v51, %v254_v50  ;;  %v911_v55 = vpack.c.bf16 %v261_v53, %v259_v52  ;;  %v258_v56 = vld [vmem:[%s1464_s2 + $0x100] sm:$0xff]  ;;  %v260_v57 = vld [vmem:[%s1464_s2 + $0x110] sm:$0xff]  ;;  %v263_v58 = vld [vmem:[%s1464_s2 + $0x128] sm:$0xff] }
  0x2c   : > { %892 = vmatprep.subr.bf16.mxu0 %v891_v23  ;;  %v265_v59 = vld [vmem:[%s1464_s2 + $0x138] sm:$0xff]  ;;  %v913_v60 = vpack.c.bf16 %v260_v57, %v258_v56  ;;  %v262_v62 = vld [vmem:[%s1464_s2 + $0x120] sm:$0xff]  ;;  %v264_v63 = vld [vmem:[%s1464_s2 + $0x130] sm:$0xff]  ;;  %v282_v23 = vsub.s32 1, %v277_v15 }
  0x2d   : > { %v915_v61 = vpack.c.bf16 %v265_v59, %v263_v58  ;;  %v267_v0 = vld [vmem:[%s1464_s2 + $0x148] sm:$0xff]  ;;  %v269_v1 = vld [vmem:[%s1464_s2 + $0x158] sm:$0xff]  ;;  %v917_v2 = vpack.c.bf16 %v264_v63, %v262_v62  ;;  %v266_v4 = vld [vmem:[%s1464_s2 + $0x140] sm:$0xff] }
  0x2e   : > { %v919_v3 = vpack.c.bf16 %v269_v1, %v267_v0  ;;  %v268_v5 = vld [vmem:[%s1464_s2 + $0x150] sm:$0xff]  ;;  %v271_v6 = vld [vmem:[%s1464_s2 + $0x168] sm:$0xff]  ;;  %v273_v7 = vld [vmem:[%s1464_s2 + $0x178] sm:$0xff] }
  0x2f   : > { %894 = vmatpush1.bf16.msra.mxu0 %v893_v28  ;;  %v921_v8 = vpack.c.bf16 %v268_v5, %v266_v4  ;;  %v923_v9 = vpack.c.bf16 %v273_v7, %v271_v6  ;;  %v270_v10 = vld [vmem:[%s1464_s2 + $0x160] sm:$0xff]  ;;  %v272_v11 = vld [vmem:[%s1464_s2 + $0x170] sm:$0xff] }
  0x30   : > { %896 = vmatprep.subr.bf16.mxu0 %v895_v29  ;;  %v925_v12 = vpack.c.bf16 %v272_v11, %v270_v10  ;;  %v224_v13 = vld [vmem:[#allocation4] sm:$0xff]  ;;  %v274_v17 = vld [vmem:[%s1465_s3] sm:$0x3] }
  0x31   : > { %v279_v18 = vrot.slane %v274_v17, %v278_v16  ;;  %v283_v24 = vrot.slane %v274_v17, %v282_v23 }
  0x33   : > { %898 = vmatpush1.bf16.msra.mxu0 %v897_v34 }
  0x34   : > { %900 = vmatprep.subr.bf16.mxu0 %v899_v37 }
  0x37   : > { %902 = vmatpush1.bf16.msra.mxu0 %v901_v42 }
  0x38   : > { %904 = vmatprep.subr.bf16.mxu0 %v903_v43 }
  0x3b   : > { %906 = vmatpush1.bf16.msra.mxu0 %v905_v48 }
  0x3c   : > { %908 = vmatprep.subr.bf16.mxu0 %v907_v49 }
  0x3f   : > { %910 = vmatpush1.bf16.msra.mxu0 %v909_v54 }
  0x40   : > { %912 = vmatprep.subr.bf16.mxu0 %v911_v55 }
  0x43   : > { %914 = vmatpush1.bf16.msra.mxu0 %v913_v60 }
  0x44   : > { %916 = vmatprep.subr.bf16.mxu0 %v915_v61 }
  0x47   : > { %918 = vmatpush1.bf16.msra.mxu0 %v917_v2 }
  0x48   : > { %920 = vmatprep.subr.bf16.mxu0 %v919_v3 }
  0x4b   : > { %922 = vmatpush1.bf16.msra.mxu0 %v921_v8 }
  0x4c   : > { %924 = vmatprep.subr.bf16.mxu0 %v923_v9 }
  0x4f   : > { %926 = vmatpush1.bf16.msra.mxu0 %v925_v12 }
  0x52   : > { %355 = vmatmul.mubr.f32.vlgmr.msra.gmra.mrb[0].mxu0 %v224_v13 }
  0x9a   : > { %v377_v33 = vpop.permute.xlu0 %376 }
 0x125   : > { %v356_v19 = vpop.f32.mrb[0].mxu0 }
 0x126   : > { %v357_v20 = vadd.f32 %v356_v19, %v279_v18  ;;  %v358_v21 = vpop.f32.mrb[1].mxu0 }
 0x127   : > { %v359_v25 = vadd.f32 %v358_v21, %v283_v24 }
 0x128   : > { %v750_v22 = vmul.f32 -1.442695, %v357_v20 }
 0x129   : > { %v751_v31 = vmul.f32 -1.442695, %v359_v25 }
 0x12a   : > { %1040 = vpow2.f32 %v750_v22 }
 0x12b   : > { %1042 = vtanh.f32 %v359_v25 }
 0x134   : > { %v1041_v26 = vpop.eup %1040 }
 0x135   : > { %v364_v27 = vadd.f32 1.0, %v1041_v26  ;;  %v1043_v28 = vpop.eup %1042 }
 0x137   : > { %1044 = vrcp.f32 %v364_v27 }
 0x138   : > { %1046 = vpow2.f32 %v751_v31 }
 0x141   : > { %v1045_v29 = vpop.eup %1044 }
 0x142   : > { %v380_v30 = vmul.f32 %v1045_v29, %v1043_v28  ;;  %v1047_v32 = vpop.eup %1046  ;;  %v379_v35 = vmul.f32 %v1045_v29, %v377_v33 }
 0x143   : > { %v371_v34 = vadd.f32 1.0, %v1047_v32 }
 0x144   : > { %382 = vrot.lane.b32.xlu0 %v380_v30, %s1134_s10 }
 0x145   : > { %1048 = vrcp.f32 %v371_v34 }
 0x14f   : > { %v1049_v38 = vpop.eup %1048 }
 0x1b6   : > { %v383_v36 = vpop.permute.xlu0 %382 }
 0x1b7   : > { %v385_v37 = vadd.f32 %v383_v36, %v379_v35 }
 0x1b9   : > { %1050 = vtanh.f32 %v385_v37  ;;  %387 = vrot.lane.b32.xlu1 %v385_v37, %s1134_s10 }
 0x1c3   : > { %v1051_v39 = vpop.eup %1050 }
 0x1c4   : > { %v392_v40 = vmul.f32 %v1051_v39, %v1049_v38 }
 0x1c6   : > { %394 = vrot.lane.b32.xlu1 %v392_v40, %s1134_s10 }
 0x22b   : > { %v388_v41 = vpop.permute.xlu1 %387 }
 0x22c   : > { %390 = vst.msk [vmem:[#allocation3] sm:$0xff] %vm286_vm1, %v388_v41 }
 0x238   : > { %v395_v42 = vpop.permute.xlu1 %394 }
 0x239   : > { %397 = vst.msk [vmem:[#allocation2] sm:$0xff] %vm286_vm1, %v395_v42 }
 0x23a PF: > { %v402_v43 = vld [vmem:[%s1212_s5] sm:$0xff]  ;;  %v403_v44 = vld [vmem:[%s1212_s5 + $0x8] sm:$0xff]  ;;  %vm419_vm3 = vcmask 523264   ;;  %v1135_v45 = vmov 0.0|0.0   ;;  %v404_v48 = vld [vmem:[%s1212_s5 + $0x10] sm:$0xff]  ;;  %vm1136_vm5 = vmmov 0   ;;  %v541_v7 = vlaneseq }
 0x23b   : > { %927 = vmatprep.subr.bf16.mxu0 %v1135_v45  ;;  %v928_v46 = vpack.c.bf16 %v403_v44, %v402_v43  ;;  %vm1374_vm4 = vmpackc.low %vm419_vm3, %vm419_vm3  ;;  %959 = vmatprep.subr.bf16.mxu1 %v1135_v45  ;;  %v405_v49 = vld [vmem:[%s1212_s5 + $0x18] sm:$0xff]  ;;  %v1137_v50 = vmov 0.0   ;;  %v406_v52 = vld [vmem:[%s1212_s5 + $0x20] sm:$0xff]  ;;  %v1138_v13 = vmov 0   ;;  %vm565_vm7 = vcmask 7168   ;;  %p770_p9 = scmp.ne.s32.totalorder %s1113_s15, 2 }
 0x23c   : > { %841 = vmatprep.mubr.msk.f32.mxu0 %vm1136_vm5, %v1137_v50  ;;  %876 = vmatprep.mubr.msk.f32.mxu1 %vm1136_vm5, %v1137_v50  ;;  %v932_v51 = vpack.c.bf16 %v405_v49, %v404_v48  ;;  %v407_v53 = vld [vmem:[%s1212_s5 + $0x28] sm:$0xff]  ;;  %v408_v55 = vld [vmem:[%s1212_s5 + $0x30] sm:$0xff]  ;;  %v409_v56 = vld [vmem:[%s1212_s5 + $0x38] sm:$0xff]  ;;  %v542_v8 = vshrl.u32 %v541_v7, 7  ;;  %v1139_v35 = vmov (!%p770_p9), 0   ;;  %s1140_s24 = smov (!%p770_p9), 64  }
 0x23d   : > { %930 = vmatpush3.bf16.xpose.msk.msra.mxu0 %vm1374_vm4, %v928_v46  ;;  %961 = vmatpush3.bf16.msra.mxu1 %v928_v46  ;;  %v936_v54 = vpack.c.bf16 %v407_v53, %v406_v52  ;;  %v940_v57 = vpack.c.bf16 %v409_v56, %v408_v55  ;;  %v410_v58 = vld [vmem:[%s1212_s5 + $0x40] sm:$0xff]  ;;  %v411_v59 = vld [vmem:[%s1212_s5 + $0x48] sm:$0xff]  ;;  %v412_v61 = vld [vmem:[%s1212_s5 + $0x50] sm:$0xff] }
 0x23e   : > { %931 = vmatprep.subr.bf16.mxu0 %v1135_v45  ;;  %962 = vmatprep.subr.bf16.mxu1 %v1135_v45  ;;  %v944_v60 = vpack.c.bf16 %v411_v59, %v410_v58  ;;  %v413_v62 = vld [vmem:[%s1212_s5 + $0x58] sm:$0xff]  ;;  %v414_v0 = vld [vmem:[%s1212_s5 + $0x60] sm:$0xff]  ;;  %v415_v1 = vld [vmem:[%s1212_s5 + $0x68] sm:$0xff] }
 0x23f   : > { %v948_v63 = vpack.c.bf16 %v413_v62, %v412_v61  ;;  %v952_v2 = vpack.c.bf16 %v415_v1, %v414_v0  ;;  %v416_v3 = vld [vmem:[%s1212_s5 + $0x70] sm:$0xff]  ;;  %v417_v4 = vld [vmem:[%s1212_s5 + $0x78] sm:$0xff]  ;;  %v769_v9 = vld [vmem:[%s211_s27] ss:$0 sm:$0xff]  ;;  %1052 = vset.pattern.permute.xlu0 %v1138_v13  ;;  %1053 = vset.pattern.permute.xlu1 %v1138_v13 }
 0x240   : > { %v956_v5 = vpack.c.bf16 %v417_v4, %v416_v3  ;;  %v418_v6 = vld [vmem:[#allocation2] sm:$0xff]  ;;  %vm548_vm6 = vcmp.eq.s32.totalorder %v542_v8, %v769_v9  ;;  %v550_v14 = vld [vmem:[#allocation5] sm:$0xff]  ;;  %v573_v28 = vld [vmem:[#allocation7] sm:$0xff] }
 0x241   : > { %964 = vmatpush3.bf16.msra.mxu1 %v932_v51  ;;  %v567_v24 = vld [vmem:[#allocation6] sm:$0xff] }
 0x242   : > { %965 = vmatprep.subr.bf16.mxu1 %v1135_v45  ;;  %v666_v41 = vld [vmem:[#allocation2] sm:$0xff] (!%p770_p9) }
 0x245   : > { %934 = vmatpush3.bf16.xpose.msk.msra.mxu0 %vm1374_vm4, %v932_v51  ;;  %967 = vmatpush3.bf16.msra.mxu1 %v936_v54 }
 0x246   : > { %935 = vmatprep.subr.bf16.mxu0 %v1135_v45  ;;  %968 = vmatprep.subr.bf16.mxu1 %v1135_v45 }
 0x249   : > { %970 = vmatpush3.bf16.msra.mxu1 %v940_v57 }
 0x24a   : > { %971 = vmatprep.subr.bf16.mxu1 %v1135_v45 }
 0x24d   : > { %938 = vmatpush3.bf16.xpose.msk.msra.mxu0 %vm1374_vm4, %v936_v54  ;;  %973 = vmatpush3.bf16.msra.mxu1 %v944_v60 }
 0x24e   : > { %939 = vmatprep.subr.bf16.mxu0 %v1135_v45  ;;  %974 = vmatprep.subr.bf16.mxu1 %v1135_v45 }
 0x251   : > { %976 = vmatpush3.bf16.msra.mxu1 %v948_v63 }
 0x252   : > { %977 = vmatprep.subr.bf16.mxu1 %v1135_v45 }
 0x255   : > { %942 = vmatpush3.bf16.xpose.msk.msra.mxu0 %vm1374_vm4, %v940_v57  ;;  %979 = vmatpush3.bf16.msra.mxu1 %v952_v2 }
 0x256   : > { %943 = vmatprep.subr.bf16.mxu0 %v1135_v45  ;;  %980 = vmatprep.subr.bf16.mxu1 %v1135_v45 }
 0x259   : > { %982 = vmatpush3.bf16.msra.mxu1 %v956_v5 }
 0x25d   : > { %946 = vmatpush3.bf16.xpose.msk.msra.mxu0 %vm1374_vm4, %v944_v60 }
 0x25e   : > { %947 = vmatprep.subr.bf16.mxu0 %v1135_v45 }
 0x265   : > { %950 = vmatpush3.bf16.xpose.msk.msra.mxu0 %vm1374_vm4, %v948_v63 }
 0x266   : > { %951 = vmatprep.subr.bf16.mxu0 %v1135_v45 }
 0x26d   : > { %954 = vmatpush3.bf16.xpose.msk.msra.mxu0 %vm1374_vm4, %v952_v2 }
 0x26e   : > { %955 = vmatprep.subr.bf16.mxu0 %v1135_v45 }
 0x275   : > { %958 = vmatpush3.bf16.xpose.msk.msra.mxu0 %vm1374_vm4, %v956_v5 }
 0x27c   : > { %842 = vmatmul.mubr.msk.f32.vlgmr.msra.gmra.mrb[0].mxu0 %vm419_vm3, %v418_v6 }
 0x34f   : > { %v537_v10 = vpop.f32.mrb[0].mxu0 }
 0x350   : > { %v843_v11 = vpop.f32.mrb[1].mxu0  ;;  %v549_v12 = vsel %vm548_vm6, %v537_v10, -1e+30 }
 0x351   : > { %551 = vmax.xlane.f32.xlu0 %v549_v12 }
 0x3de   : > { %v552_v15 = vpop.xlane.xlu0 %551 }
 0x3df   : > { %v553_v16 = vmax.f32 %v550_v14, %v552_v15 }
 0x3e1   : > { %v554_v17 = vsub.f32 %v550_v14, %v553_v16  ;;  %566 = vst.msk [vmem:[#allocation5] sm:$0xff] %vm565_vm7, %v553_v16  ;;  %559 = vperm.xlu0 %1052, %v553_v16  }
 0x3e3   : > { %v555_v22 = vmul.f32 1.442695, %v554_v17 }
 0x3e5   : > { %1058 = vset.pattern.permute.xlu0 (!%p770_p9), %v1139_v35 }
 0x460   : > { %v560_v18 = vpop.permute.xlu0 %559 }
 0x461   : > { %v562_v19 = vsub.f32 %v549_v12, %v560_v18 }
 0x463   : > { %v563_v20 = vmul.f32 1.442695, %v562_v19 }
 0x465   : > { %1054 = vpow2.f32 %v563_v20 }
 0x466   : > { %1056 = vpow2.f32 %v555_v22 }
 0x46f   : > { %v1055_v21 = vpop.eup %1054 }
 0x470   : > { %569 = vadd.xlane.f32.xlu1 %v1055_v21  ;;  %877 = vmatmul.mubr.f32.vlgmr.msra.gmra.mrb[0].mxu1 %v1055_v21  ;;  %v1057_v23 = vpop.eup %1056 }
 0x471   : > { %v568_v25 = vmul.f32 %v1057_v23, %v567_v24 }
 0x481   : > { %576 = vperm.xlu1 %1053, %v1057_v23  }
 0x4fd   : > { %v570_v26 = vpop.xlane.xlu1 %569 }
 0x4fe   : > { %v571_v27 = vadd.f32 %v570_v26, %v568_v25 }
 0x500   : > { %572 = vst.msk [vmem:[#allocation6] sm:$0xff] %vm565_vm7, %v571_v27 }
 0x501   : > { %v577_v29 = vpop.permute.xlu1 %576 }
 0x502   : > { %v579_v30 = vmul.f32 %v577_v29, %v573_v28 }
 0x507   : > { %v657_v34 = vld [vmem:[#allocation6] sm:$0xff] (!%p770_p9) }
 0x508   : > { %v658_v36 = vadd.f32 (!%p770_p9), 1e-16, %v657_v34 }
 0x50a   : > { %661 = vperm.xlu0 (!%p770_p9), %1058, %v658_v36  }
 0x540   : > { %655 = sbr.rel (%p770_p9) target bundleno = 1548 (0x60c), region = 48 }
 0x543   : > { %v646_v31 = vpop.f32.mrb[0].mxu1 }
 0x544   : > { %v650_v32 = vadd.f32 %v646_v31, %v579_v30  ;;  %v878_v33 = vpop.f32.mrb[1].mxu1 }
 0x546   : > { %651 = vst.msk [vmem:[#allocation7] sm:$0xff] %vm419_vm3, %v650_v32 }
 0x54d   : > { %v656_v38 = vld [vmem:[#allocation7] sm:$0xff] }
 0x589   : > { %v662_v37 = vpop.permute.xlu0 %661 }
 0x58a   : > { %1059 = vrcp.f32 %v662_v37 }
 0x594   : > { %v1060_v39 = vpop.eup %1059 }
 0x595   : > { %v665_v40 = vmul.f32 %v1060_v39, %v656_v38 }
 0x597   : > { %668 = vrot.lane.b32.xlu0 %v665_v40, %s1140_s24 }
 0x609   : > { %v669_v42 = vpop.permute.xlu0 %668 }
 0x60a   : > { %v671_v43 = vsel %vm419_vm3, %v666_v41, %v669_v42 }
 0x60b   : > { %672 = vst [vmem:[#allocation4] sm:$0xff] %v671_v43  ;;  %673 = vst [vmem:[#allocation8] sm:$0xff] %v671_v43 }
 0x60c PF: > { %p1421_p10 = scmp.eq.s32.totalorder %s741_s20, 8  ;;  %s1141_s27 = smov [#allocation8]  }
 0x60d   : > { %s681_s12 = sshll.u32 %s1141_s27, 4  ;;  %s682_s12 = int_to_ptr.vmem [resolvable:$true] %s681_s12 }
 0x60e   : > { %s1061_s13 = scalar_lea.vmem %s682_s12, 128  ;;  %p1068_p0 = scmp.lt.s32.totalorder %s682_s12, %s682_s12 }
 0x60f   : > { %p1062_p11 = scmp.ne.s32.totalorder %s682_s12, %s1061_s13  ;;  %p1069_p1 = scmp.lt.s32.totalorder %s1061_s13, %s1061_s13 }
 0x611   : > { %p1063_p12 = pnand %p1062_p11, %p1421_p10  ;;  %p1070_p2 = por %p1069_p1, %p1068_p0 }
 0x613   : > { %p1064_p13 = pneg %p1063_p12 }
 0x615   : > { %p1071_p3 = pnand %p1070_p2, %p1064_p13 }
 0x617   : > { %1074 = shalt.err (!%p1071_p3)
}
 0x618   : > { %s1075_s20 = scalar_lea.hbm %s1466_s4, 128 }
 0x619   : > { %p1076_p4 = scmp.ne.s32.totalorder %s1466_s4, %s1075_s20  ;;  %p1081_p7 = scmp.lt.u32.totalorder %s1075_s20, %s1466_s4 }
 0x61b   : > { %p1077_p5 = pnand %p1076_p4, %p1421_p10 }
 0x61d   : > { %p1078_p6 = pneg %p1077_p5 }
 0x61f   : > { %p1083_p8 = pnand %p1081_p7, %p1078_p6 }
 0x621   : > { %1086 = shalt.err (!%p1083_p8)
}
 0x622   : > { %984 = dma.vmem_to_hbm [thread:$0]  (%p1421_p10), %s682_s12, 128, %s1466_s4, [#allocation9]  }
 0x623   : > { %1108 = dma.done.wait (%p1421_p10), [#allocation9], 128  }
 0x624   : > { %1110 = vsyncadd (%p1421_p10), [#allocation9], 4294967168 }
 0x625 PF: > { %s15_s19 = sadd.s32 1, %s1129_s19   ;;  %s1470_s15 = smov %s1121_s17 }
 0x626   : > { %p12_p9 = scmp.ge.s32.totalorder %s15_s19, 11   ;;  %s1471_s16 = smov %s1125_s18 }
 0x627   : > { %s1472_s17 = smov %s1475_s21  ;;  %s1473_s18 = smov %s1479_s22 }
 0x628   :  { %14 = sbr.rel (!%p12_p9) target bundleno = 3 (0x3), region = 78 }
 0x62f   :  { %694 = vsyncpa [#allocation9], 1 }
 0x630   :  { %696 = vsyncpa [#allocation9 + $0x1], 1 }

</bundles_post_ra>
